<compile_context>
chip_gen: v5e
topology: v5e:2x2
jax: 0.10.0
libtpu: 0.0.40
codegen_flags: <defaults>
</compile_context>

<pallas_src>
import functools

import jax
import jax.numpy as jnp
from jax.experimental import pallas as pl
from jax.experimental.pallas import tpu as pltpu

LN_EPS = 1e-6        # TRAR LayerNorm default eps
_TM_MAX = 1024       # upper cap on the row tile
_VMEM_BLOCK_BUDGET = 24 << 20   # budget for pipelined blocks (safe across gens)


def _round_up(x, m):
    return ((x + m - 1) // m) * m


def _cls_both_kernel(lang_ref, img_ref, w_ref, b_ref, o_ref, *, inv_d, mm_dtype):
    # Add in the input dtype (native bf16 VALU path on v6e/v7x), upcast once
    # to f32 for the LayerNorm statistics.
    x = (lang_ref[...] + img_ref[...]).astype(jnp.float32)      # (TM, D)

    # One-pass mean / variance.
    s = jnp.sum(x, axis=-1, keepdims=True)                       # (TM, 1)
    ss = jnp.sum(x * x, axis=-1, keepdims=True)                  # (TM, 1)
    mean = s * inv_d
    var = ss * inv_d - mean * mean
    inv = jax.lax.rsqrt(var + LN_EPS)

    # gamma/beta are folded into w_ref/b_ref in the wrapper.
    y = (x - mean) * inv                                         # (TM, D) f32

    out = jnp.dot(y.astype(mm_dtype), w_ref[...],
                  preferred_element_type=jnp.float32)            # (TM, O_pad)
    o_ref[...] = (out + b_ref[...]).astype(o_ref.dtype)


def cls_layer_both_forward(lang_feat, img_feat, gamma, beta, w_t, b,
                           *, tm=None, matmul_dtype=None):
    """lang_feat/img_feat: (..., D). gamma/beta: (D,). w_t: (D, O). b: (O,)."""
    assert lang_feat.shape == img_feat.shape
    orig_shape = lang_feat.shape
    D = int(orig_shape[-1])
    O = int(w_t.shape[-1])

    rows = 1
    for s_ in orig_shape[:-1]:
        rows *= int(s_)

    o_p = _round_up(O, 128)  # lane-dense output width

    # ---- Fold the LayerNorm affine into the projection (f32 math). ----
    mm_dtype = (jnp.dtype(matmul_dtype) if matmul_dtype is not None
                else jnp.dtype(w_t.dtype))
    w32 = w_t.astype(jnp.float32)
    w_eff = (gamma.astype(jnp.float32)[:, None] * w32).astype(mm_dtype)   # (D, O)
    b_eff = beta.astype(jnp.float32) @ w32 + b.astype(jnp.float32)        # (O,) f32
    if o_p != O:
        w_eff = jnp.pad(w_eff, ((0, 0), (0, o_p - O)))
        b_eff = jnp.pad(b_eff, (0, o_p - O))
    b_eff = b_eff.reshape(1, o_p)

    in_itemsize = jnp.dtype(lang_feat.dtype).itemsize
    out_dtype = lang_feat.dtype
    out_itemsize = jnp.dtype(out_dtype).itemsize
    w_itemsize = jnp.dtype(mm_dtype).itemsize

    # ---- Explicit VMEM budgeting & balanced row tile. ----
    fixed_bytes = 2 * (D * o_p * w_itemsize + o_p * 4)       # resident W + bias (dbl-buf)
    per_row_bytes = (2 * 2 * D * in_itemsize                 # lang+img, double-buffered
                     + 2 * o_p * out_itemsize                # output tile, double-buffered
                     + (2 * D + o_p) * 4)                    # f32 working set (x, y, acc)
    if tm is None:
        avail = max(_VMEM_BLOCK_BUDGET - fixed_bytes, 8 * per_row_bytes)
        tm_cap = max(((avail // per_row_bytes) // 8) * 8, 8)
        tm_cap = min(tm_cap, _TM_MAX)
        # Balance the grid so final-tile padding stays < one sublane group.
        n_tiles = max(pl.cdiv(rows, tm_cap), 1)
        tm = min(_round_up(pl.cdiv(rows, n_tiles), 8), tm_cap)
    rows_p = _round_up(rows, tm)

    vmem_limit = int(tm * per_row_bytes + fixed_bytes + (2 << 20))
    vmem_limit = max(vmem_limit, 8 << 20)

    # ---- Flatten leading dims; keep native dtype (no wrapper upcast). ----
    lang2d = lang_feat.reshape(rows, D)
    img2d = img_feat.reshape(rows, D)
    if rows_p != rows:
        pad_rows = ((0, rows_p - rows), (0, 0))
        lang2d = jnp.pad(lang2d, pad_rows)
        img2d = jnp.pad(img2d, pad_rows)

    bytes_accessed = (2 * rows_p * D * in_itemsize
                      + D * o_p * w_itemsize + o_p * 4
                      + rows_p * o_p * out_itemsize)

    kernel = functools.partial(_cls_both_kernel, inv_d=1.0 / D, mm_dtype=mm_dtype)

    out2d = pl.pallas_call(
        kernel,
        out_shape=jax.ShapeDtypeStruct((rows_p, o_p), out_dtype),
        grid_spec=pltpu.PrefetchScalarGridSpec(
            num_scalar_prefetch=0,
            grid=(rows_p // tm,),
            in_specs=[
                pl.BlockSpec((tm, D), lambda i: (i, 0)),    # lang tile (streamed)
                pl.BlockSpec((tm, D), lambda i: (i, 0)),    # img tile (streamed)
                pl.BlockSpec((D, o_p), lambda i: (0, 0)),   # folded W (resident)
                pl.BlockSpec((1, o_p), lambda i: (0, 0)),   # folded b (resident)
            ],
            out_specs=pl.BlockSpec((tm, o_p), lambda i: (i, 0)),
        ),
        compiler_params=pltpu.CompilerParams(
            dimension_semantics=("parallel",),  # rows independent; sharded across TCs
            vmem_limit_bytes=vmem_limit,
        ),
        cost_estimate=pl.CostEstimate(
            flops=2 * rows_p * D * o_p,
            transcendentals=rows_p,             # one rsqrt per row
            bytes_accessed=int(bytes_accessed),
        ),
    )(lang2d, img2d, w_eff, b_eff)

    # Drop row padding and the lane-dense output padding.
    out2d = out2d[:rows, :O]
    return out2d.reshape(orig_shape[:-1] + (O,))


def reference_forward(lang_feat, img_feat, gamma, beta, w_t, b):
    x = (lang_feat + img_feat).astype(jnp.float32)
    mean = jnp.mean(x, axis=-1, keepdims=True)
    var = jnp.mean((x - mean) ** 2, axis=-1, keepdims=True)
    y = (x - mean) / jnp.sqrt(var + LN_EPS) * gamma + beta
    return y @ w_t + b


if __name__ == "__main__":
    key = jax.random.PRNGKey(0)
    k1, k2, k3, k4 = jax.random.split(key, 4)

    batch, seq, input_dim, output_dim = 2, 8, 32, 16

    lang_feat = jax.random.normal(k1, (batch, seq, input_dim), dtype=jnp.float32)
    img_feat = jax.random.normal(k2, (batch, seq, input_dim), dtype=jnp.float32)

    # Deterministic synthetic parameters (not a checkpoint load).
    gamma = jnp.ones((input_dim,), jnp.float32)
    beta = jnp.zeros((input_dim,), jnp.float32)
    # PyTorch Linear weight is (output_dim, input_dim); store its transpose.
    w = jax.random.normal(k3, (output_dim, input_dim), dtype=jnp.float32) * 0.05
    w_t = w.T
    b = jax.random.normal(k4, (output_dim,), dtype=jnp.float32) * 0.01

    out = cls_layer_both_forward(lang_feat, img_feat, gamma, beta, w_t, b)
    out = jax.block_until_ready(out)

    ref = reference_forward(lang_feat, img_feat, gamma, beta, w_t, b)
    assert out.shape == (batch, seq, output_dim)
    assert jnp.allclose(out, ref, atol=1e-4, rtol=1e-4), "mismatch vs reference"

    print("KERNEL_OK")
</pallas_src>

<mosaic_0001>
module attributes {stable_mosaic.version = 11 : i64} {
  func.func @_cls_both_kernel(%arg0: i32, %arg1: memref<16x32xf32, #tpu.memory_space<vmem>>, %arg2: memref<16x32xf32, #tpu.memory_space<vmem>>, %arg3: memref<32x128xf32, #tpu.memory_space<vmem>>, %arg4: memref<1x128xf32, #tpu.memory_space<vmem>>, %arg5: memref<16x128xf32, #tpu.memory_space<vmem>>) attributes {dimension_semantics = [#tpu.dimension_semantics<parallel>], iteration_bounds = array<i64: 1>, scalar_prefetch = 0 : i64, scratch_operands = 0 : i64, tpu.core_type = #tpu.core_type<tc>, window_params = [{transform_indices = @transform_0, window_bounds = array<i64: 16, 32>}, {transform_indices = @transform_1, window_bounds = array<i64: 16, 32>}, {pipeline_mode = #tpu.pipeline_mode<synchronous>, transform_indices = @transform_2, window_bounds = array<i64: 32, 128>}, {pipeline_mode = #tpu.pipeline_mode<synchronous>, transform_indices = @transform_3, window_bounds = array<i64: 1, 128>}, {transform_indices = @transform_4, window_bounds = array<i64: 16, 128>}]} {
    %c0 = arith.constant 0 : index
    %c0_0 = arith.constant 0 : index
    %0 = vector.load %arg1[%c0, %c0_0] : memref<16x32xf32, #tpu.memory_space<vmem>>, vector<16x32xf32>
    %c0_1 = arith.constant 0 : index
    %c0_2 = arith.constant 0 : index
    %1 = vector.load %arg2[%c0_1, %c0_2] : memref<16x32xf32, #tpu.memory_space<vmem>>, vector<16x32xf32>
    %2 = arith.addf %0, %1 : vector<16x32xf32>
    %cst = arith.constant dense<0.000000e+00> : vector<16xf32>
    %3 = vector.multi_reduction <add>, %2, %cst [1] : vector<16x32xf32> to vector<16xf32>
    %4 = vector.shape_cast %3 : vector<16xf32> to vector<16x1xf32>
    %5 = arith.mulf %2, %2 : vector<16x32xf32>
    %cst_3 = arith.constant dense<0.000000e+00> : vector<16xf32>
    %6 = vector.multi_reduction <add>, %5, %cst_3 [1] : vector<16x32xf32> to vector<16xf32>
    %7 = vector.shape_cast %6 : vector<16xf32> to vector<16x1xf32>
    %cst_4 = arith.constant 3.125000e-02 : f32
    %8 = vector.broadcast %cst_4 : f32 to vector<16x1xf32>
    %9 = arith.mulf %4, %8 : vector<16x1xf32>
    %cst_5 = arith.constant 3.125000e-02 : f32
    %10 = vector.broadcast %cst_5 : f32 to vector<16x1xf32>
    %11 = arith.mulf %7, %10 : vector<16x1xf32>
    %12 = arith.mulf %9, %9 : vector<16x1xf32>
    %13 = arith.subf %11, %12 : vector<16x1xf32>
    %cst_6 = arith.constant 9.99999997E-7 : f32
    %14 = vector.broadcast %cst_6 : f32 to vector<16x1xf32>
    %15 = arith.addf %13, %14 : vector<16x1xf32>
    %16 = math.rsqrt %15 : vector<16x1xf32>
    %17 = vector.broadcast %9 : vector<16x1xf32> to vector<16x32xf32>
    %18 = arith.subf %2, %17 : vector<16x32xf32>
    %19 = vector.broadcast %16 : vector<16x1xf32> to vector<16x32xf32>
    %20 = arith.mulf %18, %19 : vector<16x32xf32>
    %c0_7 = arith.constant 0 : index
    %c0_8 = arith.constant 0 : index
    %21 = vector.load %arg3[%c0_7, %c0_8] : memref<32x128xf32, #tpu.memory_space<vmem>>, vector<32x128xf32>
    %cst_9 = arith.constant dense<0.000000e+00> : vector<16x128xf32>
    %22 = tpu.matmul %20, %21, %cst_9 {dimension_numbers = #tpu.dot_dimension_numbers<[1], [0], [0], [1], [0, 0, 1, 1], [], []>} : vector<16x32xf32>, vector<32x128xf32>, vector<16x128xf32> -> vector<16x128xf32>
    %c0_10 = arith.constant 0 : index
    %c0_11 = arith.constant 0 : index
    %23 = vector.load %arg4[%c0_10, %c0_11] : memref<1x128xf32, #tpu.memory_space<vmem>>, vector<1x128xf32>
    %24 = vector.broadcast %23 : vector<1x128xf32> to vector<16x128xf32>
    %25 = arith.addf %22, %24 : vector<16x128xf32>
    %c0_12 = arith.constant 0 : index
    %c0_13 = arith.constant 0 : index
    %26 = vector.load %arg5[%c0_12, %c0_13] : memref<16x128xf32, #tpu.memory_space<vmem>>, vector<16x128xf32>
    tpu.vector_store %arg5[%c0_12, %c0_13], %25 {strides = array<i32>} : memref<16x128xf32, #tpu.memory_space<vmem>>, vector<16x128xf32>,
    return
  }
  func.func @transform_0(%arg0: i32) -> (i32, i32) {
    %c0_i32 = arith.constant 0 : i32
    %c0_i32_0 = arith.constant 0 : i32
    return %arg0, %c0_i32 : i32, i32
  }
  func.func @transform_1(%arg0: i32) -> (i32, i32) {
    %c0_i32 = arith.constant 0 : i32
    %c0_i32_0 = arith.constant 0 : i32
    return %arg0, %c0_i32 : i32, i32
  }
  func.func @transform_2(%arg0: i32) -> (i32, i32) {
    %c0_i32 = arith.constant 0 : i32
    %c0_i32_0 = arith.constant 0 : i32
    %c0_i32_1 = arith.constant 0 : i32
    return %c0_i32, %c0_i32_0 : i32, i32
  }
  func.func @transform_3(%arg0: i32) -> (i32, i32) {
    %c0_i32 = arith.constant 0 : i32
    %c0_i32_0 = arith.constant 0 : i32
    %c0_i32_1 = arith.constant 0 : i32
    return %c0_i32, %c0_i32_0 : i32, i32
  }
  func.func @transform_4(%arg0: i32) -> (i32, i32) {
    %c0_i32 = arith.constant 0 : i32
    %c0_i32_0 = arith.constant 0 : i32
    return %arg0, %c0_i32 : i32, i32
  }
}

</mosaic_0001>

<bundles_post_ra>
// kernel: tpu_custom_call.1
= control target key start
LH: loop header
LB: loop body
LE: loop exit
PB: predicated region body
PF: predicated region fallthrough
CT: control target
= control target key end

     0   :  { %9 = vsyncpa [#allocation3], 0  ;;  %s362_s0 = inlined_call_operand.hbm [shape: f32[16,32], index: 0, kind: input, shape index: {}]   ;;  %s363_s1 = inlined_call_operand.hbm [shape: f32[16,32], index: 1, kind: input, shape index: {}]   ;;  %s364_s2 = inlined_call_operand.hbm [shape: f32[32,128], index: 2, kind: input, shape index: {}]   ;;  %s365_s3 = inlined_call_operand.vmem [shape: f32[1,128], index: 3, kind: input, shape index: {}]   ;;  %s366_s4 = inlined_call_operand.hbm [shape: f32[16,128], index: 4, kind: output, shape index: {}]  }
   0x1   :  { %10 = vsyncpa [#allocation6], 0 }
   0x2   :  { %11 = vsyncpa [#allocation4], 0  ;;  %s29_s17 = sshll.u32 %s363_s1, 4  ;;  %s298_s18 = smov [#allocation5]   ;;  %s30_s17 = int_to_ptr.hbm [resolvable:$true] %s29_s17 }
   0x3   :  { %s31_s19 = sshll.u32 %s298_s18, 4  ;;  %s16_s22 = sshll.u32 %s362_s0, 4  ;;  %s32_s19 = int_to_ptr.vmem [resolvable:$true] %s31_s19  ;;  %s17_s22 = int_to_ptr.hbm [resolvable:$true] %s16_s22 }
   0x4   :  { %s299_s23 = smov 128   ;;  %s300_s24 = smov 8  }
   0x5   :  { %37 = dma.hbm_to_vmem [thread:$0]  %s30_s17, 256, %s32_s19, [#allocation6], %s299_s23, %s299_s23, %s300_s24  }
   0x6   :  { %s301_s25 = smov [#allocation2]   ;;  %s42_s1 = sshll.u32 %s364_s2, 4  ;;  %s43_s1 = int_to_ptr.hbm [resolvable:$true] %s42_s1 }
   0x7   :  { %s18_s26 = sshll.u32 %s301_s25, 4  ;;  %s302_s0 = smov [#allocation7]   ;;  %s19_s26 = int_to_ptr.vmem [resolvable:$true] %s18_s26 }
   0x8   :  { %24 = dma.hbm_to_vmem [thread:$0]  %s17_s22, 256, %s19_s26, [#allocation3], %s299_s23, %s299_s23, %s300_s24  }
   0x9   :  { %s44_s29 = sshll.u32 %s302_s0, 4  ;;  %s45_s29 = int_to_ptr.vmem [resolvable:$true] %s44_s29 }
   0xa   :  { %50 = dma.hbm_to_vmem [thread:$0]  %s43_s1, 512, %s45_s29, [#allocation6], %s299_s23, %s299_s23, %s300_s24  }
   0xb   :  { %292 = dma.done.wait [#allocation3], 256  }
   0xc   :  { %293 = vsyncadd [#allocation3], 4294967040 }
   0xd   :  { %294 = dma.done.wait [#allocation6], 768  }
   0xe   :  { %295 = vsyncadd [#allocation6], 4294966528  ;;  %v65_v0 = vld [vmem:[#allocation2] sm:$0xff]  ;;  %v67_v1 = vld [vmem:[#allocation5] sm:$0xff]  ;;  %vm71_vm0 = vcmask 261120   ;;  %s303_s5 = smov [#allocation8]  }
   0xf   :  { %v66_v2 = vld [vmem:[#allocation2 + $0x8] sm:$0xff]  ;;  %v69_v3 = vadd.f32 %v67_v1, %v65_v0  ;;  %v68_v4 = vld [vmem:[#allocation5 + $0x8] sm:$0xff]  ;;  %v122_v13 = vld [vmem:[#allocation7 + $0x10] sm:$0xff]  ;;  %s163_s6 = sshll.u32 %s303_s5, 4  ;;  %s165_s9 = sshll.u32 %s366_s4, 4  ;;  %s164_s6 = int_to_ptr.vmem [resolvable:$true] %s163_s6  ;;  %s166_s9 = int_to_ptr.hbm [resolvable:$true] %s165_s9 }
  0x10   :  { %v70_v7 = vadd.f32 %v68_v4, %v66_v2  ;;  %v123_v12 = vld [vmem:[#allocation7 + $0x18] sm:$0xff]  ;;  %v121_v14 = vld [vmem:[#allocation7 + $0x8] sm:$0xff]  ;;  %v120_v15 = vld [vmem:[#allocation7] sm:$0xff] }
  0x11   :  { %v72_v5 = vsel %vm71_vm0, %v69_v3, 0.0  ;;  %v78_v6 = vmul.f32 %v69_v3, %v69_v3  ;;  %146 = vmatpush.msra.mxu0 %v123_v12  ;;  %181 = vmatpush.msra.mxu1 %v123_v12  ;;  %v191_v48 = vld [vmem:[%s365_s3] ss:$0 sm:$0xff] }
  0x12   :  { %73 = vadd.xlane.f32.xlu0 %v72_v5  ;;  %v79_v9 = vmul.f32 %v70_v7, %v70_v7  ;;  %v75_v10 = vsel %vm71_vm0, %v70_v7, 0.0 }
  0x13   :  { %v80_v8 = vsel %vm71_vm0, %v78_v6, 0.0  ;;  %147 = vmatpush.msra.mxu0 %v122_v13  ;;  %182 = vmatpush.msra.mxu1 %v122_v13 }
  0x14   :  { %81 = vadd.xlane.f32.xlu1 %v80_v8  ;;  %v83_v11 = vsel %vm71_vm0, %v79_v9, 0.0 }
  0x15   :  { %148 = vmatpush.msra.mxu0 %v121_v14  ;;  %183 = vmatpush.msra.mxu1 %v121_v14 }
  0x17   :  { %149 = vmatpush.msra.mxu0 %v120_v15  ;;  %184 = vmatpush.msra.mxu1 %v120_v15 }
  0x1a   :  { %76 = vadd.xlane.f32.xlu0 %v75_v10 }
  0x1c   :  { %84 = vadd.xlane.f32.xlu1 %v83_v11 }
  0x85   :  { %v74_v16 = vpop.xlane.xlu0 %73 }
  0x86   :  { %v86_v17 = vmul.f32 0.03125, %v74_v16 }
  0x87   :  { %v82_v18 = vpop.xlane.xlu1 %81 }
  0x88   :  { %v90_v19 = vmul.f32 %v86_v17, %v86_v17  ;;  %v88_v20 = vmul.f32 0.03125, %v82_v18  ;;  %v116_v38 = vsub.f32 %v69_v3, %v86_v17 }
  0x8a   :  { %v92_v21 = vsub.f32 %v88_v20, %v90_v19 }
  0x8c   :  { %v94_v22 = vadd.f32 1e-06, %v92_v21 }
  0x8d   :  { %v77_v23 = vpop.xlane.xlu0 %76 }
  0x8e   :  { %192 = vrsqrt.f32 %v94_v22  ;;  %v87_v24 = vmul.f32 0.03125, %v77_v23  ;;  %vm102_vm2 = vweird.f32 %v94_v22 }
  0x8f   :  { %v85_v25 = vpop.xlane.xlu1 %84 }
  0x90   :  { %v91_v26 = vmul.f32 %v87_v24, %v87_v24  ;;  %v89_v27 = vmul.f32 0.03125, %v85_v25  ;;  %v117_v45 = vsub.f32 %v70_v7, %v87_v24 }
  0x92   :  { %v93_v28 = vsub.f32 %v89_v27, %v91_v26 }
  0x94   :  { %v193_v29 = vpop.eup %192  ;;  %v95_v30 = vadd.f32 1e-06, %v93_v28 }
  0x95   :  { %v97_v31 = vmul.f32 %v193_v29, %v94_v22  ;;  %vm103_vm1 = vweird.f32 %v193_v29 }
  0x96   :  { %194 = vrsqrt.f32 %v95_v30  ;;  %vm104_vm3 = vmor %vm102_vm2, %vm103_vm1  ;;  %vm112_vm5 = vweird.f32 %v95_v30 }
  0x97   :  { %v98_v32 = vmul.f32 %v193_v29, %v97_v31 }
  0x99   :  { %v99_v33 = vmul.f32 0.5, %v98_v32 }
  0x9b   :  { %v100_v34 = vsub.f32 1.5, %v99_v33 }
  0x9c   :  { %v195_v35 = vpop.eup %194 }
  0x9d   :  { %v107_v36 = vmul.f32 %v195_v35, %v95_v30  ;;  %v101_v37 = vmul.f32 %v193_v29, %v100_v34  ;;  %vm113_vm4 = vweird.f32 %v195_v35 }
  0x9e   :  { %vm114_vm6 = vmor %vm112_vm5, %vm113_vm4 }
  0x9f   :  { %v108_v39 = vmul.f32 %v195_v35, %v107_v36  ;;  %v105_v40 = vsel %vm104_vm3, %v193_v29, %v101_v37 }
  0xa0   :  { %v118_v41 = vmul.f32 %v116_v38, %v105_v40 }
  0xa1   :  { %v109_v42 = vmul.f32 0.5, %v108_v39 }
  0xa2   :  { %179 = vmatmul.msk.f32.vlgmr.msra.gmra.mxu0 %vm71_vm0, %v118_v41 }
  0xa3   :  { %v110_v43 = vsub.f32 1.5, %v109_v42 }
  0xa5   :  { %v111_v44 = vmul.f32 %v195_v35, %v110_v43 }
  0xa7   :  { %v115_v46 = vsel %vm114_vm6, %v195_v35, %v111_v44 }
  0xa8   :  { %v119_v47 = vmul.f32 %v117_v45, %v115_v46 }
  0xaa   :  { %180 = vmatmul.msk.f32.vlgmr.msra.gmra.mxu1 %vm71_vm0, %v119_v47 }
 0x11f   :  { %v151_v49 = vpop.f32.mrf.mxu0 }
 0x120   :  { %v152_v50 = vadd.f32 %v191_v48, %v151_v49 }
 0x122   :  { %157 = vst [vmem:[#allocation8] sm:$0xff] %v152_v50 }
 0x127   :  { %v154_v51 = vpop.f32.mrf.mxu1 }
 0x128   :  { %v155_v52 = vadd.f32 %v191_v48, %v154_v51 }
 0x12a   :  { %158 = vst [vmem:[#allocation8 + $0x8] sm:$0xff] %v155_v52 }
 0x12b   :  { %171 = dma.vmem_to_hbm [thread:$0]  %s164_s6, 256, %s166_s9, [#allocation4], %s299_s23, %s299_s23, %s300_s24  }
 0x12c   :  { %296 = dma.done.wait [#allocation4], 256  }
 0x12d   :  { %297 = vsyncadd [#allocation4], 4294967040 }
 0x12e   :  { %176 = vsyncpa [#allocation3], 1 }
 0x12f   :  { %177 = vsyncpa [#allocation6], 1 }
 0x130   :  { %178 = vsyncpa [#allocation4], 1 }

</bundles_post_ra>
